<compile_context>
chip_gen: v7x
topology: tpu7x:2x2x1
jax: 0.10.0
libtpu: 0.0.40
codegen_flags: <defaults>
</compile_context>

<pallas_src>
import functools

import jax
import jax.numpy as jnp
from jax.experimental import pallas as pl
from jax.experimental.pallas import tpu as pltpu

IN_DIM = 784      # 28*28 flattened image
HIDDEN = 256
OUT_DIM = 10
OUT_PAD = 128     # 10 padded up to 128 so the last matmul + stores stay lane-dense


def _round_up(x, m):
    return ((x + m - 1) // m) * m


def mlp_kernel(x_ref,
               w1_ref, b1_ref,
               w2_ref, b2_ref,
               w3_ref, b3_ref,
               w4_ref, b4_ref,
               w5_ref, b5_ref,
               o_ref):
    # x tile: (TM, 784) f32 straight from HBM (no pre-pass); cast to bf16 in-register
    # for the MXU.  All matmuls accumulate in f32; bias add + ReLU stay in f32
    # (required for v5e's VPU, fine on v6e/v7x).
    x = x_ref[...].astype(jnp.bfloat16)

    h = jnp.dot(x, w1_ref[...], preferred_element_type=jnp.float32)
    h = jnp.maximum(h + b1_ref[...], 0.0)

    h = jnp.dot(h.astype(jnp.bfloat16), w2_ref[...], preferred_element_type=jnp.float32)
    h = jnp.maximum(h + b2_ref[...], 0.0)

    h = jnp.dot(h.astype(jnp.bfloat16), w3_ref[...], preferred_element_type=jnp.float32)
    h = jnp.maximum(h + b3_ref[...], 0.0)

    h = jnp.dot(h.astype(jnp.bfloat16), w4_ref[...], preferred_element_type=jnp.float32)
    h = jnp.maximum(h + b4_ref[...], 0.0)

    o = jnp.dot(h.astype(jnp.bfloat16), w5_ref[...], preferred_element_type=jnp.float32)
    o_ref[...] = (o + b5_ref[...]).astype(o_ref.dtype)   # bf16 lane-dense store


def prepare_params(params):
    """Cast weights to bf16 once; pad only the last layer's output dim 10 -> 128."""
    prepped = []
    for idx, (w, b) in enumerate(params):
        fan_in, fan_out = w.shape
        if idx == len(params) - 1:
            w = jnp.pad(w, ((0, 0), (0, OUT_PAD - fan_out)))   # 10 -> 128 (zeros)
            b = jnp.pad(b, ((0, 0), (0, OUT_PAD - fan_out)))
        prepped.append((w.astype(jnp.bfloat16), b.astype(jnp.float32)))
    return prepped


@functools.partial(jax.jit, static_argnames=("tm",))
def nn_forward(x, prepped_params, tm=512):
    """x: (B, 784) float32 (already flattened). prepped_params: from prepare_params()."""
    B, F = x.shape
    assert F == IN_DIM

    # --- Batch-tile selection ------------------------------------------------
    #  * clamp for small batches so a B=8 request is not 94% padding,
    #  * keep >=2 grid steps at moderate batch so v7x's second TensorCore works,
    #  * rebalance so the last tile carries minimal padding.
    tm_eff = max(16, min(tm, _round_up(B, 16)))
    if B > 128:
        tm_eff = min(tm_eff, _round_up(pl.cdiv(B, 2), 16))
    steps = pl.cdiv(B, tm_eff)
    tm_eff = _round_up(pl.cdiv(B, steps), 16)
    b_pad = steps * tm_eff

    # Only the batch dim is (maybe) zero-padded; x stays f32 and is cast to bf16
    # inside the kernel, so there is no standalone feature pad/cast pre-pass.
    x_in = x if b_pad == B else jnp.pad(x, ((0, b_pad - B), (0, 0)))

    flat_args = [x_in]
    in_specs = [pl.BlockSpec((tm_eff, IN_DIM), lambda i: (i, 0))]
    for w, b in prepped_params:
        flat_args.extend([w, b])
        # Full-array blocks with constant index_map -> DMA'd once, VMEM-resident
        # across all batch tiles.
        in_specs.append(pl.BlockSpec(w.shape, lambda i: (0, 0)))
        in_specs.append(pl.BlockSpec(b.shape, lambda i: (0, 0)))

    out = pl.pallas_call(
        mlp_kernel,
        out_shape=jax.ShapeDtypeStruct((b_pad, OUT_PAD), jnp.bfloat16),
        grid=(steps,),
        in_specs=in_specs,
        out_specs=pl.BlockSpec((tm_eff, OUT_PAD), lambda i: (i, 0)),
        compiler_params=pltpu.CompilerParams(
            dimension_semantics=("parallel",),
            vmem_limit_bytes=(64 * 1024 * 1024 if tm_eff >= 1024 else None),
        ),
    )(*flat_args)

    # Tiny epilogue on a (B, 10) array: drop padded rows/cols, return f32 like the
    # PyTorch module.
    return out[:B, :OUT_DIM].astype(jnp.float32)


def init_params(key):
    """Deterministic init mirroring nn.Linear shapes: 784->256->256->256->256->10."""
    dims = [(IN_DIM, HIDDEN), (HIDDEN, HIDDEN), (HIDDEN, HIDDEN),
            (HIDDEN, HIDDEN), (HIDDEN, OUT_DIM)]
    params = []
    for i, (fan_in, fan_out) in enumerate(dims):
        kw, kb, key = jax.random.split(jax.random.fold_in(key, i), 3)
        bound = 1.0 / jnp.sqrt(fan_in)
        w = jax.random.uniform(kw, (fan_in, fan_out), jnp.float32, -bound, bound)
        b = jax.random.uniform(kb, (1, fan_out), jnp.float32, -bound, bound)
        params.append((w, b))
    return params


def reference_forward_f32(x, params):
    h = x
    for i, (w, b) in enumerate(params):
        h = h @ w + b
        if i < len(params) - 1:
            h = jnp.maximum(h, 0.0)
    return h


def reference_forward_bf16(x, params):
    """Emulates the kernel's precision: bf16 matmul inputs, f32 accumulate/bias/ReLU,
    bf16 final store."""
    h = x.astype(jnp.bfloat16)
    for i, (w, b) in enumerate(params):
        h = jnp.dot(h, w.astype(jnp.bfloat16), preferred_element_type=jnp.float32) + b
        if i < len(params) - 1:
            h = jnp.maximum(h, 0.0).astype(jnp.bfloat16)
    return h.astype(jnp.bfloat16).astype(jnp.float32)


def _check(x, params):
    out = jax.block_until_ready(nn_forward(x, prepare_params(params)))
    assert out.shape == (x.shape[0], OUT_DIM)
    ref_bf16 = reference_forward_bf16(x, params)
    assert jnp.allclose(out, ref_bf16, atol=1e-2, rtol=1e-2), (
        float(jnp.max(jnp.abs(out - ref_bf16))))
    ref_f32 = reference_forward_f32(x, params)
    assert jnp.allclose(out, ref_f32, atol=1e-1, rtol=1e-1), (
        float(jnp.max(jnp.abs(out - ref_f32))))
    return out


if __name__ == "__main__":
    key = jax.random.PRNGKey(0)
    kx, kx2, kp = jax.random.split(key, 3)

    params = init_params(kp)

    # Small batch; input is the flattened 28x28 image (784 features), matching the
    # module's x.view(x.shape[0], -1) feeding Linear(784, 256).
    B = 8
    x_img = jax.random.normal(kx, (B, 1, 28, 28), jnp.float32)
    x = x_img.reshape(B, -1)           # glue reshape (the module's x.view)
    _check(x, params)

    # Second, non-tile-multiple batch to exercise the multi-step grid / rebalanced
    # tiling path (2 grid steps, padded last tile).
    x2 = jax.random.normal(kx2, (300, IN_DIM), jnp.float32)
    _check(x2, params)

    print("KERNEL_OK")
</pallas_src>

<mosaic_0001>
module attributes {stable_mosaic.version = 11 : i64} {
  func.func @mlp_kernel(%arg0: i32, %arg1: memref<16x784xf32, #tpu.memory_space<vmem>>, %arg2: memref<784x256xbf16, #tpu.memory_space<vmem>>, %arg3: memref<1x256xf32, #tpu.memory_space<vmem>>, %arg4: memref<256x256xbf16, #tpu.memory_space<vmem>>, %arg5: memref<1x256xf32, #tpu.memory_space<vmem>>, %arg6: memref<256x256xbf16, #tpu.memory_space<vmem>>, %arg7: memref<1x256xf32, #tpu.memory_space<vmem>>, %arg8: memref<256x256xbf16, #tpu.memory_space<vmem>>, %arg9: memref<1x256xf32, #tpu.memory_space<vmem>>, %arg10: memref<256x128xbf16, #tpu.memory_space<vmem>>, %arg11: memref<1x128xf32, #tpu.memory_space<vmem>>, %arg12: memref<16x128xbf16, #tpu.memory_space<vmem>>) attributes {dimension_semantics = [#tpu.dimension_semantics<parallel>], iteration_bounds = array<i64: 1>, scalar_prefetch = 0 : i64, scratch_operands = 0 : i64, tpu.core_type = #tpu.core_type<tc>, window_params = [{transform_indices = @transform_0, window_bounds = array<i64: 16, 784>}, {pipeline_mode = #tpu.pipeline_mode<synchronous>, transform_indices = @transform_1, window_bounds = array<i64: 784, 256>}, {pipeline_mode = #tpu.pipeline_mode<synchronous>, transform_indices = @transform_2, window_bounds = array<i64: 1, 256>}, {pipeline_mode = #tpu.pipeline_mode<synchronous>, transform_indices = @transform_3, window_bounds = array<i64: 256, 256>}, {pipeline_mode = #tpu.pipeline_mode<synchronous>, transform_indices = @transform_4, window_bounds = array<i64: 1, 256>}, {pipeline_mode = #tpu.pipeline_mode<synchronous>, transform_indices = @transform_5, window_bounds = array<i64: 256, 256>}, {pipeline_mode = #tpu.pipeline_mode<synchronous>, transform_indices = @transform_6, window_bounds = array<i64: 1, 256>}, {pipeline_mode = #tpu.pipeline_mode<synchronous>, transform_indices = @transform_7, window_bounds = array<i64: 256, 256>}, {pipeline_mode = #tpu.pipeline_mode<synchronous>, transform_indices = @transform_8, window_bounds = array<i64: 1, 256>}, {pipeline_mode = #tpu.pipeline_mode<synchronous>, transform_indices = @transform_9, window_bounds = array<i64: 256, 128>}, {pipeline_mode = #tpu.pipeline_mode<synchronous>, transform_indices = @transform_10, window_bounds = array<i64: 1, 128>}, {transform_indices = @transform_11, window_bounds = array<i64: 16, 128>}]} {
    %c0 = arith.constant 0 : index
    %c0_0 = arith.constant 0 : index
    %0 = vector.load %arg1[%c0, %c0_0] : memref<16x784xf32, #tpu.memory_space<vmem>>, vector<16x784xf32>
    %1 = arith.truncf %0 : vector<16x784xf32> to vector<16x784xbf16>
    %c0_1 = arith.constant 0 : index
    %c0_2 = arith.constant 0 : index
    %2 = vector.load %arg2[%c0_1, %c0_2] : memref<784x256xbf16, #tpu.memory_space<vmem>>, vector<784x256xbf16>
    %cst = arith.constant dense<0.000000e+00> : vector<16x256xf32>
    %3 = tpu.matmul %1, %2, %cst {dimension_numbers = #tpu.dot_dimension_numbers<[1], [0], [0], [1], [0, 0, 1, 1], [], []>} : vector<16x784xbf16>, vector<784x256xbf16>, vector<16x256xf32> -> vector<16x256xf32>
    %c0_3 = arith.constant 0 : index
    %c0_4 = arith.constant 0 : index
    %4 = vector.load %arg3[%c0_3, %c0_4] : memref<1x256xf32, #tpu.memory_space<vmem>>, vector<1x256xf32>
    %5 = vector.broadcast %4 : vector<1x256xf32> to vector<16x256xf32>
    %6 = arith.addf %3, %5 : vector<16x256xf32>
    %cst_5 = arith.constant 0.000000e+00 : f32
    %7 = vector.broadcast %cst_5 : f32 to vector<16x256xf32>
    %8 = arith.maximumf %6, %7 : vector<16x256xf32>
    %9 = arith.truncf %8 : vector<16x256xf32> to vector<16x256xbf16>
    %c0_6 = arith.constant 0 : index
    %c0_7 = arith.constant 0 : index
    %10 = vector.load %arg4[%c0_6, %c0_7] : memref<256x256xbf16, #tpu.memory_space<vmem>>, vector<256x256xbf16>
    %cst_8 = arith.constant dense<0.000000e+00> : vector<16x256xf32>
    %11 = tpu.matmul %9, %10, %cst_8 {dimension_numbers = #tpu.dot_dimension_numbers<[1], [0], [0], [1], [0, 0, 1, 1], [], []>} : vector<16x256xbf16>, vector<256x256xbf16>, vector<16x256xf32> -> vector<16x256xf32>
    %c0_9 = arith.constant 0 : index
    %c0_10 = arith.constant 0 : index
    %12 = vector.load %arg5[%c0_9, %c0_10] : memref<1x256xf32, #tpu.memory_space<vmem>>, vector<1x256xf32>
    %13 = vector.broadcast %12 : vector<1x256xf32> to vector<16x256xf32>
    %14 = arith.addf %11, %13 : vector<16x256xf32>
    %cst_11 = arith.constant 0.000000e+00 : f32
    %15 = vector.broadcast %cst_11 : f32 to vector<16x256xf32>
    %16 = arith.maximumf %14, %15 : vector<16x256xf32>
    %17 = arith.truncf %16 : vector<16x256xf32> to vector<16x256xbf16>
    %c0_12 = arith.constant 0 : index
    %c0_13 = arith.constant 0 : index
    %18 = vector.load %arg6[%c0_12, %c0_13] : memref<256x256xbf16, #tpu.memory_space<vmem>>, vector<256x256xbf16>
    %cst_14 = arith.constant dense<0.000000e+00> : vector<16x256xf32>
    %19 = tpu.matmul %17, %18, %cst_14 {dimension_numbers = #tpu.dot_dimension_numbers<[1], [0], [0], [1], [0, 0, 1, 1], [], []>} : vector<16x256xbf16>, vector<256x256xbf16>, vector<16x256xf32> -> vector<16x256xf32>
    %c0_15 = arith.constant 0 : index
    %c0_16 = arith.constant 0 : index
    %20 = vector.load %arg7[%c0_15, %c0_16] : memref<1x256xf32, #tpu.memory_space<vmem>>, vector<1x256xf32>
    %21 = vector.broadcast %20 : vector<1x256xf32> to vector<16x256xf32>
    %22 = arith.addf %19, %21 : vector<16x256xf32>
    %cst_17 = arith.constant 0.000000e+00 : f32
    %23 = vector.broadcast %cst_17 : f32 to vector<16x256xf32>
    %24 = arith.maximumf %22, %23 : vector<16x256xf32>
    %25 = arith.truncf %24 : vector<16x256xf32> to vector<16x256xbf16>
    %c0_18 = arith.constant 0 : index
    %c0_19 = arith.constant 0 : index
    %26 = vector.load %arg8[%c0_18, %c0_19] : memref<256x256xbf16, #tpu.memory_space<vmem>>, vector<256x256xbf16>
    %cst_20 = arith.constant dense<0.000000e+00> : vector<16x256xf32>
    %27 = tpu.matmul %25, %26, %cst_20 {dimension_numbers = #tpu.dot_dimension_numbers<[1], [0], [0], [1], [0, 0, 1, 1], [], []>} : vector<16x256xbf16>, vector<256x256xbf16>, vector<16x256xf32> -> vector<16x256xf32>
    %c0_21 = arith.constant 0 : index
    %c0_22 = arith.constant 0 : index
    %28 = vector.load %arg9[%c0_21, %c0_22] : memref<1x256xf32, #tpu.memory_space<vmem>>, vector<1x256xf32>
    %29 = vector.broadcast %28 : vector<1x256xf32> to vector<16x256xf32>
    %30 = arith.addf %27, %29 : vector<16x256xf32>
    %cst_23 = arith.constant 0.000000e+00 : f32
    %31 = vector.broadcast %cst_23 : f32 to vector<16x256xf32>
    %32 = arith.maximumf %30, %31 : vector<16x256xf32>
    %33 = arith.truncf %32 : vector<16x256xf32> to vector<16x256xbf16>
    %c0_24 = arith.constant 0 : index
    %c0_25 = arith.constant 0 : index
    %34 = vector.load %arg10[%c0_24, %c0_25] : memref<256x128xbf16, #tpu.memory_space<vmem>>, vector<256x128xbf16>
    %cst_26 = arith.constant dense<0.000000e+00> : vector<16x128xf32>
    %35 = tpu.matmul %33, %34, %cst_26 {dimension_numbers = #tpu.dot_dimension_numbers<[1], [0], [0], [1], [0, 0, 1, 1], [], []>} : vector<16x256xbf16>, vector<256x128xbf16>, vector<16x128xf32> -> vector<16x128xf32>
    %c0_27 = arith.constant 0 : index
    %c0_28 = arith.constant 0 : index
    %36 = vector.load %arg11[%c0_27, %c0_28] : memref<1x128xf32, #tpu.memory_space<vmem>>, vector<1x128xf32>
    %37 = vector.broadcast %36 : vector<1x128xf32> to vector<16x128xf32>
    %38 = arith.addf %35, %37 : vector<16x128xf32>
    %39 = arith.truncf %38 : vector<16x128xf32> to vector<16x128xbf16>
    %c0_29 = arith.constant 0 : index
    %c0_30 = arith.constant 0 : index
    %40 = vector.load %arg12[%c0_29, %c0_30] : memref<16x128xbf16, #tpu.memory_space<vmem>>, vector<16x128xbf16>
    tpu.vector_store %arg12[%c0_29, %c0_30], %39 {strides = array<i32>} : memref<16x128xbf16, #tpu.memory_space<vmem>>, vector<16x128xbf16>,
    return
  }
  func.func @transform_0(%arg0: i32) -> (i32, i32) {
    %c0_i32 = arith.constant 0 : i32
    %c0_i32_0 = arith.constant 0 : i32
    return %arg0, %c0_i32 : i32, i32
  }
  func.func @transform_1(%arg0: i32) -> (i32, i32) {
    %c0_i32 = arith.constant 0 : i32
    %c0_i32_0 = arith.constant 0 : i32
    %c0_i32_1 = arith.constant 0 : i32
    return %c0_i32, %c0_i32_0 : i32, i32
  }
  func.func @transform_2(%arg0: i32) -> (i32, i32) {
    %c0_i32 = arith.constant 0 : i32
    %c0_i32_0 = arith.constant 0 : i32
    %c0_i32_1 = arith.constant 0 : i32
    return %c0_i32, %c0_i32_0 : i32, i32
  }
  func.func @transform_3(%arg0: i32) -> (i32, i32) {
    %c0_i32 = arith.constant 0 : i32
    %c0_i32_0 = arith.constant 0 : i32
    %c0_i32_1 = arith.constant 0 : i32
    return %c0_i32, %c0_i32_0 : i32, i32
  }
  func.func @transform_4(%arg0: i32) -> (i32, i32) {
    %c0_i32 = arith.constant 0 : i32
    %c0_i32_0 = arith.constant 0 : i32
    %c0_i32_1 = arith.constant 0 : i32
    return %c0_i32, %c0_i32_0 : i32, i32
  }
  func.func @transform_5(%arg0: i32) -> (i32, i32) {
    %c0_i32 = arith.constant 0 : i32
    %c0_i32_0 = arith.constant 0 : i32
    %c0_i32_1 = arith.constant 0 : i32
    return %c0_i32, %c0_i32_0 : i32, i32
  }
  func.func @transform_6(%arg0: i32) -> (i32, i32) {
    %c0_i32 = arith.constant 0 : i32
    %c0_i32_0 = arith.constant 0 : i32
    %c0_i32_1 = arith.constant 0 : i32
    return %c0_i32, %c0_i32_0 : i32, i32
  }
  func.func @transform_7(%arg0: i32) -> (i32, i32) {
    %c0_i32 = arith.constant 0 : i32
    %c0_i32_0 = arith.constant 0 : i32
    %c0_i32_1 = arith.constant 0 : i32
    return %c0_i32, %c0_i32_0 : i32, i32
  }
  func.func @transform_8(%arg0: i32) -> (i32, i32) {
    %c0_i32 = arith.constant 0 : i32
    %c0_i32_0 = arith.constant 0 : i32
    %c0_i32_1 = arith.constant 0 : i32
    return %c0_i32, %c0_i32_0 : i32, i32
  }
  func.func @transform_9(%arg0: i32) -> (i32, i32) {
    %c0_i32 = arith.constant 0 : i32
    %c0_i32_0 = arith.constant 0 : i32
    %c0_i32_1 = arith.constant 0 : i32
    return %c0_i32, %c0_i32_0 : i32, i32
  }
  func.func @transform_10(%arg0: i32) -> (i32, i32) {
    %c0_i32 = arith.constant 0 : i32
    %c0_i32_0 = arith.constant 0 : i32
    %c0_i32_1 = arith.constant 0 : i32
    return %c0_i32, %c0_i32_0 : i32, i32
  }
  func.func @transform_11(%arg0: i32) -> (i32, i32) {
    %c0_i32 = arith.constant 0 : i32
    %c0_i32_0 = arith.constant 0 : i32
    return %arg0, %c0_i32 : i32, i32
  }
}

</mosaic_0001>

<bundles_post_ra>
// kernel: nn_forward.1
= control target key start
LH: loop header
LB: loop body
LE: loop exit
PB: predicated region body
PF: predicated region fallthrough
CT: control target
= control target key end

     0   :  { %16 = vsyncpa [#allocation3], 0  ;;  %s2777_s0 = inlined_call_operand.vmem [shape: f32[16,784], index: 0, kind: input, shape index: {}]   ;;  %s2778_s1 = inlined_call_operand.hbm [shape: bf16[784,256], index: 1, kind: input, shape index: {}]   ;;  %s2779_s2 = inlined_call_operand.vmem [shape: f32[1,256], index: 2, kind: input, shape index: {}]   ;;  %s2780_s3 = inlined_call_operand.hbm [shape: bf16[256,256], index: 3, kind: input, shape index: {}]   ;;  %s2781_s4 = inlined_call_operand.vmem [shape: f32[1,256], index: 4, kind: input, shape index: {}]   ;;  %s2782_s5 = inlined_call_operand.hbm [shape: bf16[256,256], index: 5, kind: input, shape index: {}]   ;;  %s2783_s6 = inlined_call_operand.vmem [shape: f32[1,256], index: 6, kind: input, shape index: {}]   ;;  %s2784_s7 = inlined_call_operand.hbm [shape: bf16[256,256], index: 7, kind: input, shape index: {}]   ;;  %s2785_s8 = inlined_call_operand.vmem [shape: f32[1,256], index: 8, kind: input, shape index: {}]   ;;  %s2786_s9 = inlined_call_operand.vmem [shape: bf16[256,128], index: 9, kind: input, shape index: {}]   ;;  %s2787_s10 = inlined_call_operand.vmem [shape: f32[1,128], index: 10, kind: input, shape index: {}]   ;;  %s2788_s11 = inlined_call_operand.vmem [shape: bf16[16,128], index: 11, kind: output, shape index: {}]  }
   0x1   :  { %17 = vsyncpa [#allocation5], 0 }
   0x2   :  { %18 = vsyncpa [#allocation8], 0  ;;  %s2516_s17 = smov [#allocation4]   ;;  %s2517_s19 = smov [#allocation2]  }
   0x3   :  { %s40_s18 = sshll.u32 %s2516_s17, 4  ;;  %s26_s20 = sshll.u32 %s2517_s19, 4  ;;  %s41_s18 = int_to_ptr.vmem [resolvable:$true] %s40_s18  ;;  %s2583_s20 = int_to_ptr.vmem [resolvable:$true] %s26_s20 }
   0x4   :  { %s2422_s23 = scalar_lea.hbm %s2780_s3, 4096 }
   0x5   :  { %p2423_p0 = scmp.ne.s32.totalorder %s2780_s3, %s2422_s23  ;;  %p2426_p1 = scmp.lt.u32.totalorder %s2422_s23, %s2780_s3 }
   0x7   :  { %p2428_p2 = pnand %p2426_p1, %p2423_p0 }
   0x9   :  { %2431 = shalt.err (!%p2428_p2)
}
   0xa   :  { %s2432_s28 = scalar_lea.vmem %s41_s18, 4096  ;;  %p2437_p4 = scmp.lt.s32.totalorder %s41_s18, %s41_s18 }
   0xb   :  { %p2433_p3 = scmp.ne.s32.totalorder %s41_s18, %s2432_s28  ;;  %p2438_p5 = scmp.lt.s32.totalorder %s2432_s28, %s2432_s28 }
   0xd   :  { %p2439_p6 = por %p2438_p5, %p2437_p4 }
   0xf   :  { %p2440_p7 = pnand %p2439_p6, %p2433_p3 }
  0x11   :  { %2443 = shalt.err (!%p2440_p7)
}
  0x12   :  { %s2518_s29 = smov 128   ;;  %s2519_s30 = smov 8  }
  0x13   :  { %46 = dma.hbm_to_vmem [thread:$0]  %s2780_s3, 4096, %s41_s18, [#allocation5], %s2518_s29, %s2518_s29, %s2519_s30  }
  0x14   :  { %s2444_s16 = scalar_lea.hbm %s2778_s1, 12544 }
  0x15   :  { %p2445_p8 = scmp.ne.s32.totalorder %s2778_s1, %s2444_s16  ;;  %p2448_p9 = scmp.lt.u32.totalorder %s2444_s16, %s2778_s1 }
  0x17   :  { %p2450_p10 = pnand %p2448_p9, %p2445_p8 }
  0x19   :  { %2453 = shalt.err (!%p2450_p10)
}
  0x1a   :  { %s2454_s23 = scalar_lea.vmem %s2583_s20, 12544  ;;  %p2459_p12 = scmp.lt.s32.totalorder %s2583_s20, %s2583_s20 }
  0x1b   :  { %p2455_p11 = scmp.ne.s32.totalorder %s2583_s20, %s2454_s23  ;;  %p2460_p13 = scmp.lt.s32.totalorder %s2454_s23, %s2454_s23 }
  0x1d   :  { %p2461_p0 = por %p2460_p13, %p2459_p12 }
  0x1f   :  { %p2462_p1 = pnand %p2461_p0, %p2455_p11 }
  0x21   :  { %2465 = shalt.err (!%p2462_p1)
}
  0x22   :  { %32 = dma.hbm_to_vmem [thread:$0]  %s2778_s1, 12544, %s2583_s20, [#allocation3], %s2518_s29, %s2518_s29, %s2519_s30  }
  0x23   :  { %s2520_s24 = smov [#allocation6]   ;;  %s2521_s26 = smov [#allocation7]  }
  0x24   :  { %s54_s25 = sshll.u32 %s2520_s24, 4  ;;  %s68_s27 = sshll.u32 %s2521_s26, 4  ;;  %s55_s25 = int_to_ptr.vmem [resolvable:$true] %s54_s25  ;;  %s2620_s27 = int_to_ptr.vmem [resolvable:$true] %s68_s27 }
  0x25   :  { %s2466_s13 = scalar_lea.hbm %s2782_s5, 4096 }
  0x26   :  { %p2467_p2 = scmp.ne.s32.totalorder %s2782_s5, %s2466_s13  ;;  %p2470_p3 = scmp.lt.u32.totalorder %s2466_s13, %s2782_s5 }
  0x28   :  { %p2472_p4 = pnand %p2470_p3, %p2467_p2 }
  0x2a   :  { %2475 = shalt.err (!%p2472_p4)
}
  0x2b   :  { %s2476_s1 = scalar_lea.vmem %s55_s25, 4096  ;;  %p2481_p6 = scmp.lt.s32.totalorder %s55_s25, %s55_s25 }
  0x2c   :  { %p2477_p5 = scmp.ne.s32.totalorder %s55_s25, %s2476_s1  ;;  %p2482_p7 = scmp.lt.s32.totalorder %s2476_s1, %s2476_s1 }
  0x2e   :  { %p2483_p8 = por %p2482_p7, %p2481_p6 }
  0x30   :  { %p2484_p9 = pnand %p2483_p8, %p2477_p5 }
  0x32   :  { %2487 = shalt.err (!%p2484_p9)
}
  0x33   :  { %60 = dma.hbm_to_vmem [thread:$0]  %s2782_s5, 4096, %s55_s25, [#allocation5], %s2518_s29, %s2518_s29, %s2519_s30  }
  0x34   :  { %s2488_s23 = scalar_lea.hbm %s2784_s7, 4096 }
  0x35   :  { %p2489_p10 = scmp.ne.s32.totalorder %s2784_s7, %s2488_s23  ;;  %p2492_p11 = scmp.lt.u32.totalorder %s2488_s23, %s2784_s7 }
  0x37   :  { %p2494_p12 = pnand %p2492_p11, %p2489_p10 }
  0x39   :  { %2497 = shalt.err (!%p2494_p12)
}
  0x3a   :  { %s2498_s28 = scalar_lea.vmem %s2620_s27, 4096  ;;  %p2503_p0 = scmp.lt.s32.totalorder %s2620_s27, %s2620_s27 }
  0x3b   :  { %p2499_p13 = scmp.ne.s32.totalorder %s2620_s27, %s2498_s28  ;;  %p2504_p1 = scmp.lt.s32.totalorder %s2498_s28, %s2498_s28 }
  0x3d   :  { %p2505_p2 = por %p2504_p1, %p2503_p0 }
  0x3f   :  { %p2506_p3 = pnand %p2505_p2, %p2499_p13 }
  0x41   :  { %2509 = shalt.err (!%p2506_p3)
}
  0x42   :  { %74 = dma.hbm_to_vmem [thread:$0]  %s2784_s7, 4096, %s2620_s27, [#allocation8], %s2518_s29, %s2518_s29, %s2519_s30  }
  0x43   :  { %2510 = dma.done.wait [#allocation3], 12544  }
  0x44   :  { %2511 = vsyncadd [#allocation3], 4294954752 }
  0x45   :  { %2512 = dma.done.wait [#allocation5], 8192  }
  0x46   :  { %2513 = vsyncadd [#allocation5], 4294959104 }
  0x47   :  { %2514 = dma.done.wait [#allocation8], 4096  }
  0x48   :  { %2515 = vsyncadd [#allocation8], 4294963200  ;;  %v2115_v0 = vld [vmem:[#allocation2 + $0x4] ss:$8 sps:$4 sm:$0xff]   ;;  %v2117_v1 = vld [vmem:[#allocation2] ss:$8 sps:$4 sm:$0xff]  }
  0x49   :  { %719 = vmatprep.subr.bf16.mxu0 %v2115_v0  ;;  %v2118_v2 = vld [vmem:[#allocation2 + $0x14] ss:$8 sps:$4 sm:$0xff]   ;;  %v2120_v3 = vld [vmem:[#allocation2 + $0x10] ss:$8 sps:$4 sm:$0xff]   ;;  %v2121_v4 = vld [vmem:[#allocation2 + $0x24] ss:$8 sps:$4 sm:$0xff]  }
  0x4a   :  { %720 = vmatpush1.bf16.msra.mxu0 %v2117_v1  ;;  %v2123_v5 = vld [vmem:[#allocation2 + $0x20] ss:$8 sps:$4 sm:$0xff]   ;;  %v2124_v6 = vld [vmem:[#allocation2 + $0x34] ss:$8 sps:$4 sm:$0xff]   ;;  %v2126_v7 = vld [vmem:[#allocation2 + $0x30] ss:$8 sps:$4 sm:$0xff]  }
  0x4b   :  { %721 = vmatprep.subr.bf16.mxu0 %v2118_v2  ;;  %v2127_v8 = vld [vmem:[#allocation2 + $0x44] ss:$8 sps:$4 sm:$0xff]   ;;  %v2129_v9 = vld [vmem:[#allocation2 + $0x40] ss:$8 sps:$4 sm:$0xff]   ;;  %v2130_v10 = vld [vmem:[#allocation2 + $0x54] ss:$8 sps:$4 sm:$0xff]  }
  0x4c   :  { %v2132_v11 = vld [vmem:[#allocation2 + $0x50] ss:$8 sps:$4 sm:$0xff]   ;;  %v2133_v12 = vld [vmem:[#allocation2 + $0x64] ss:$8 sps:$4 sm:$0xff]   ;;  %v2135_v16 = vld [vmem:[#allocation2 + $0x60] ss:$8 sps:$4 sm:$0xff]  }
  0x4d   :  { %v95_v13 = vld [vmem:[%s2777_s0 + $0x8] sm:$0xff]  ;;  %v102_v14 = vld [vmem:[%s2777_s0 + $0x40] sm:$0xff]  ;;  %v2136_v17 = vld [vmem:[#allocation2 + $0x74] ss:$8 sps:$4 sm:$0xff]   ;;  %vm715_vm0 = vcmask 130048  }
  0x4e   :  { %722 = vmatpush1.bf16.msra.mxu0 %v2120_v3  ;;  %v109_v15 = vpack.c.bf16 %v102_v14, %v95_v13  ;;  %v2138_v18 = vld [vmem:[#allocation2 + $0x70] ss:$8 sps:$4 sm:$0xff]   ;;  %v2139_v19 = vld [vmem:[#allocation2 + $0x84] ss:$8 sps:$4 sm:$0xff]   ;;  %v2141_v20 = vld [vmem:[#allocation2 + $0x80] ss:$8 sps:$4 sm:$0xff]  }
  0x4f   :  { %723 = vmatprep.subr.bf16.mxu0 %v2121_v4  ;;  %v2142_v21 = vld [vmem:[#allocation2 + $0x94] ss:$8 sps:$4 sm:$0xff]   ;;  %v2144_v22 = vld [vmem:[#allocation2 + $0x90] ss:$8 sps:$4 sm:$0xff]   ;;  %v2145_v23 = vld [vmem:[#allocation2 + $0xa4] ss:$8 sps:$4 sm:$0xff]  }
  0x50   :  { %751 = vmatprep.mubr.bf16.mxu0 %v109_v15  ;;  %v2147_v24 = vld [vmem:[#allocation2 + $0xa0] ss:$8 sps:$4 sm:$0xff]   ;;  %v2148_v25 = vld [vmem:[#allocation2 + $0xb4] ss:$8 sps:$4 sm:$0xff]   ;;  %v2150_v26 = vld [vmem:[#allocation2 + $0xb0] ss:$8 sps:$4 sm:$0xff]  }
  0x51   :  { %v2151_v27 = vld [vmem:[#allocation2 + $0xc4] ss:$8 sps:$4 sm:$0xff]   ;;  %v2153_v28 = vld [vmem:[#allocation2 + $0xc0] ss:$8 sps:$4 sm:$0xff]   ;;  %v2154_v29 = vld [vmem:[#allocation2 + $0xd4] ss:$8 sps:$4 sm:$0xff]  }
  0x52   :  { %724 = vmatpush1.bf16.msra.mxu0 %v2123_v5  ;;  %v2156_v30 = vld [vmem:[#allocation2 + $0xd0] ss:$8 sps:$4 sm:$0xff]   ;;  %v2157_v31 = vld [vmem:[#allocation2 + $0xe4] ss:$8 sps:$4 sm:$0xff]   ;;  %v2159_v32 = vld [vmem:[#allocation2 + $0xe0] ss:$8 sps:$4 sm:$0xff]  }
  0x53   :  { %725 = vmatprep.subr.bf16.mxu0 %v2124_v6  ;;  %v2160_v33 = vld [vmem:[#allocation2 + $0xf4] ss:$8 sps:$4 sm:$0xff]   ;;  %v2162_v34 = vld [vmem:[#allocation2 + $0xf0] ss:$8 sps:$4 sm:$0xff]   ;;  %v2165_v35 = vld [vmem:[#allocation2 + $0x104] ss:$8 sps:$4 sm:$0xff]  }
  0x54   :  { %v94_v36 = vld [vmem:[%s2777_s0] sm:$0xff]  ;;  %v101_v37 = vld [vmem:[%s2777_s0 + $0x38] sm:$0xff]  ;;  %v104_v39 = vld [vmem:[%s2777_s0 + $0x50] sm:$0xff] }
  0x55   :  { %v97_v38 = vld [vmem:[%s2777_s0 + $0x18] sm:$0xff]  ;;  %v108_v40 = vpack.c.bf16 %v101_v37, %v94_v36  ;;  %v2163_v41 = vld [vmem:[#allocation2 + $0x100] ss:$8 sps:$4 sm:$0xff]   ;;  %v2171_v45 = vld [vmem:[#allocation2 + $0x124] ss:$8 sps:$4 sm:$0xff]  }
  0x56   :  { %726 = vmatpush1.bf16.msra.mxu0 %v2126_v7  ;;  %v111_v42 = vpack.c.bf16 %v104_v39, %v97_v38  ;;  %v2168_v43 = vld [vmem:[#allocation2 + $0x114] ss:$8 sps:$4 sm:$0xff]   ;;  %v2166_v44 = vld [vmem:[#allocation2 + $0x110] ss:$8 sps:$4 sm:$0xff]   ;;  %v2169_v46 = vld [vmem:[#allocation2 + $0x120] ss:$8 sps:$4 sm:$0xff]  }
  0x57   :  { %727 = vmatprep.subr.bf16.mxu0 %v2127_v8  ;;  %v2174_v47 = vld [vmem:[#allocation2 + $0x134] ss:$8 sps:$4 sm:$0xff]   ;;  %v2172_v48 = vld [vmem:[#allocation2 + $0x130] ss:$8 sps:$4 sm:$0xff]   ;;  %v2177_v49 = vld [vmem:[#allocation2 + $0x144] ss:$8 sps:$4 sm:$0xff]  }
  0x58   :  { %v2262_v50 = vld [vmem:[#allocation4 + $0x4] ss:$8 sps:$4 sm:$0xff]   ;;  %v2264_v51 = vld [vmem:[#allocation4] ss:$8 sps:$4 sm:$0xff]   ;;  %v2265_v52 = vld [vmem:[#allocation4 + $0x14] ss:$8 sps:$4 sm:$0xff]  }
  0x59   :  { %v2175_v53 = vld [vmem:[#allocation2 + $0x140] ss:$8 sps:$4 sm:$0xff]   ;;  %v2180_v54 = vld [vmem:[#allocation2 + $0x154] ss:$8 sps:$4 sm:$0xff]   ;;  %1101 = vmatprep.subr.bf16.mxu1 %v2262_v50  ;;  %v2178_v57 = vld [vmem:[#allocation2 + $0x150] ss:$8 sps:$4 sm:$0xff]  }
  0x5a   :  { %728 = vmatpush1.bf16.msra.mxu0 %v2129_v9  ;;  %1102 = vmatpush1.bf16.msra.mxu1 %v2264_v51  ;;  %v2267_v55 = vld [vmem:[#allocation4 + $0x10] ss:$8 sps:$4 sm:$0xff]   ;;  %v2268_v56 = vld [vmem:[#allocation4 + $0x24] ss:$8 sps:$4 sm:$0xff]   ;;  %v2183_v58 = vld [vmem:[#allocation2 + $0x164] ss:$8 sps:$4 sm:$0xff]  }
  0x5b   :  { %729 = vmatprep.subr.bf16.mxu0 %v2130_v10  ;;  %1103 = vmatprep.subr.bf16.mxu1 %v2265_v52  ;;  %v2181_v59 = vld [vmem:[#allocation2 + $0x160] ss:$8 sps:$4 sm:$0xff]   ;;  %v2270_v60 = vld [vmem:[#allocation4 + $0x20] ss:$8 sps:$4 sm:$0xff]   ;;  %v2271_v61 = vld [vmem:[#allocation4 + $0x34] ss:$8 sps:$4 sm:$0xff]  }
  0x5c   :  { %v2186_v62 = vld [vmem:[#allocation2 + $0x174] ss:$8 sps:$4 sm:$0xff]   ;;  %v2273_v63 = vld [vmem:[#allocation4 + $0x30] ss:$8 sps:$4 sm:$0xff]   ;;  %v2184_v1 = vld [vmem:[#allocation2 + $0x170] ss:$8 sps:$4 sm:$0xff]  }
  0x5d   :  { %v2274_v0 = vld [vmem:[#allocation4 + $0x44] ss:$8 sps:$4 sm:$0xff]   ;;  %v2189_v2 = vld [vmem:[#allocation2 + $0x184] ss:$8 sps:$4 sm:$0xff]   ;;  %v2276_v3 = vld [vmem:[#allocation4 + $0x40] ss:$8 sps:$4 sm:$0xff]  }
  0x5e   :  { %730 = vmatpush1.bf16.msra.mxu0 %v2132_v11  ;;  %1104 = vmatpush1.bf16.msra.mxu1 %v2267_v55  ;;  %v2277_v4 = vld [vmem:[#allocation4 + $0x54] ss:$8 sps:$4 sm:$0xff]   ;;  %v2187_v5 = vld [vmem:[#allocation2 + $0x180] ss:$8 sps:$4 sm:$0xff]   ;;  %v2192_v6 = vld [vmem:[#allocation2 + $0x194] ss:$8 sps:$4 sm:$0xff]  }
  0x5f   :  { %731 = vmatprep.subr.bf16.mxu0 %v2133_v12  ;;  %1105 = vmatprep.subr.bf16.mxu1 %v2268_v56  ;;  %v2279_v7 = vld [vmem:[#allocation4 + $0x50] ss:$8 sps:$4 sm:$0xff]   ;;  %v2280_v8 = vld [vmem:[#allocation4 + $0x64] ss:$8 sps:$4 sm:$0xff]   ;;  %v2190_v9 = vld [vmem:[#allocation2 + $0x190] ss:$8 sps:$4 sm:$0xff]  }
  0x60   :  { %v2195_v10 = vld [vmem:[#allocation2 + $0x1a4] ss:$8 sps:$4 sm:$0xff]   ;;  %v2282_v11 = vld [vmem:[#allocation4 + $0x60] ss:$8 sps:$4 sm:$0xff]   ;;  %v2193_v13 = vld [vmem:[#allocation2 + $0x1a0] ss:$8 sps:$4 sm:$0xff]  }
  0x61   :  { %v2283_v12 = vld [vmem:[#allocation4 + $0x74] ss:$8 sps:$4 sm:$0xff]   ;;  %v2198_v14 = vld [vmem:[#allocation2 + $0x1b4] ss:$8 sps:$4 sm:$0xff]   ;;  %v2285_v15 = vld [vmem:[#allocation4 + $0x70] ss:$8 sps:$4 sm:$0xff]  }
  0x62   :  { %732 = vmatpush1.bf16.msra.mxu0 %v2135_v16  ;;  %1106 = vmatpush1.bf16.msra.mxu1 %v2270_v60  ;;  %v2286_v16 = vld [vmem:[#allocation4 + $0x84] ss:$8 sps:$4 sm:$0xff]   ;;  %v2213_v36 = vld [vmem:[#allocation2 + $0x204] ss:$8 sps:$4 sm:$0xff]   ;;  %v2300_v39 = vld [vmem:[#allocation4 + $0xc0] ss:$8 sps:$4 sm:$0xff]  }
  0x63   :  { %733 = vmatprep.subr.bf16.mxu0 %v2136_v17  ;;  %1107 = vmatprep.subr.bf16.mxu1 %v2271_v61  ;;  %v2196_v17 = vld [vmem:[#allocation2 + $0x1b0] ss:$8 sps:$4 sm:$0xff]   ;;  %v99_v37 = vld [vmem:[%s2777_s0 + $0x28] sm:$0xff]  ;;  %v106_v38 = vld [vmem:[%s2777_s0 + $0x60] sm:$0xff] }
  0x64   :  { %v2225_v50 = vld [vmem:[#allocation2 + $0x244] ss:$8 sps:$4 sm:$0xff]   ;;  %v2223_v51 = vld [vmem:[#allocation2 + $0x240] ss:$8 sps:$4 sm:$0xff]   ;;  %v2228_v52 = vld [vmem:[#allocation2 + $0x254] ss:$8 sps:$4 sm:$0xff]  }
  0x65   :  { %v2229_v55 = vld [vmem:[#allocation2 + $0x260] ss:$8 sps:$4 sm:$0xff]   ;;  %v2234_v56 = vld [vmem:[#allocation2 + $0x274] ss:$8 sps:$4 sm:$0xff]   ;;  %v2238_v61 = vld [vmem:[#allocation2 + $0x290] ss:$8 sps:$4 sm:$0xff]  }
  0x66   :  { %734 = vmatpush1.bf16.msra.mxu0 %v2138_v18  ;;  %1108 = vmatpush1.bf16.msra.mxu1 %v2273_v63  ;;  %v2201_v18 = vld [vmem:[#allocation2 + $0x1c4] ss:$8 sps:$4 sm:$0xff]   ;;  %v2240_v60 = vld [vmem:[#allocation2 + $0x294] ss:$8 sps:$4 sm:$0xff]   ;;  %v2241_v63 = vld [vmem:[#allocation2 + $0x2a0] ss:$8 sps:$4 sm:$0xff]  }
  0x67   :  { %735 = vmatprep.subr.bf16.mxu0 %v2139_v19  ;;  %1109 = vmatprep.subr.bf16.mxu1 %v2274_v0  ;;  %v2288_v19 = vld [vmem:[#allocation4 + $0x80] ss:$8 sps:$4 sm:$0xff]   ;;  %v2246_v0 = vld [vmem:[#allocation2 + $0x2b4] ss:$8 sps:$4 sm:$0xff]  }
  0x6a   :  { %736 = vmatpush1.bf16.msra.mxu0 %v2141_v20  ;;  %1110 = vmatpush1.bf16.msra.mxu1 %v2276_v3  ;;  %v2289_v20 = vld [vmem:[#allocation4 + $0x94] ss:$8 sps:$4 sm:$0xff]   ;;  %v2247_v3 = vld [vmem:[#allocation2 + $0x2c0] ss:$8 sps:$4 sm:$0xff]  }
  0x6b   :  { %737 = vmatprep.subr.bf16.mxu0 %v2142_v21  ;;  %1111 = vmatprep.subr.bf16.mxu1 %v2277_v4  ;;  %v2199_v21 = vld [vmem:[#allocation2 + $0x1c0] ss:$8 sps:$4 sm:$0xff]   ;;  %v2252_v4 = vld [vmem:[#allocation2 + $0x2d4] ss:$8 sps:$4 sm:$0xff]  }
  0x6e   :  { %738 = vmatpush1.bf16.msra.mxu0 %v2144_v22  ;;  %1112 = vmatpush1.bf16.msra.mxu1 %v2279_v7  ;;  %v2204_v22 = vld [vmem:[#allocation2 + $0x1d4] ss:$8 sps:$4 sm:$0xff]   ;;  %v2253_v7 = vld [vmem:[#allocation2 + $0x2e0] ss:$8 sps:$4 sm:$0xff]  }
  0x6f   :  { %739 = vmatprep.subr.bf16.mxu0 %v2145_v23  ;;  %1113 = vmatprep.subr.bf16.mxu1 %v2280_v8  ;;  %v2291_v23 = vld [vmem:[#allocation4 + $0x90] ss:$8 sps:$4 sm:$0xff]   ;;  %v2258_v8 = vld [vmem:[#allocation2 + $0x2f4] ss:$8 sps:$4 sm:$0xff]  }
  0x72   :  { %740 = vmatpush1.bf16.msra.mxu0 %v2147_v24  ;;  %1114 = vmatpush1.bf16.msra.mxu1 %v2282_v11  ;;  %v2292_v24 = vld [vmem:[#allocation4 + $0xa4] ss:$8 sps:$4 sm:$0xff]  }
  0x73   :  { %741 = vmatprep.subr.bf16.mxu0 %v2148_v25  ;;  %1115 = vmatprep.subr.bf16.mxu1 %v2283_v12  ;;  %v2202_v25 = vld [vmem:[#allocation2 + $0x1d0] ss:$8 sps:$4 sm:$0xff]   ;;  %v2261_v12 = vld [vmem:[#allocation2 + $0x304] ss:$8 sps:$4 sm:$0xff]  }
  0x74   :  { %v105_v11 = vld [vmem:[%s2777_s0 + $0x58] sm:$0xff] }
  0x76   :  { %742 = vmatpush1.bf16.msra.mxu0 %v2150_v26  ;;  %1116 = vmatpush1.bf16.msra.mxu1 %v2285_v15  ;;  %v2207_v26 = vld [vmem:[#allocation2 + $0x1e4] ss:$8 sps:$4 sm:$0xff]   ;;  %v2522_v15 = vmov 0  }
  0x77   :  { %743 = vmatprep.subr.bf16.mxu0 %v2151_v27  ;;  %1117 = vmatprep.subr.bf16.mxu1 %v2286_v16  ;;  %v2294_v27 = vld [vmem:[#allocation4 + $0xa0] ss:$8 sps:$4 sm:$0xff]  }
  0x78   :  { %v100_v16 = vld [vmem:[%s2777_s0 + $0x30] sm:$0xff] }
  0x7a   :  { %744 = vmatpush1.bf16.msra.mxu0 %v2153_v28  ;;  %1118 = vmatpush1.bf16.msra.mxu1 %v2288_v19  ;;  %v2295_v28 = vld [vmem:[#allocation4 + $0xb4] ss:$8 sps:$4 sm:$0xff]   ;;  %v2303_v19 = vld [vmem:[#allocation4 + $0xd0] ss:$8 sps:$4 sm:$0xff]  }
  0x7b   :  { %745 = vmatprep.subr.bf16.mxu0 %v2154_v29  ;;  %1119 = vmatprep.subr.bf16.mxu1 %v2289_v20  ;;  %v2205_v29 = vld [vmem:[#allocation2 + $0x1e0] ss:$8 sps:$4 sm:$0xff]   ;;  %v2304_v20 = vld [vmem:[#allocation4 + $0xe4] ss:$8 sps:$4 sm:$0xff]  }
  0x7e   :  { %746 = vmatpush1.bf16.msra.mxu0 %v2156_v30  ;;  %1120 = vmatpush1.bf16.msra.mxu1 %v2291_v23  ;;  %v2210_v30 = vld [vmem:[#allocation2 + $0x1f4] ss:$8 sps:$4 sm:$0xff]   ;;  %v2309_v23 = vld [vmem:[#allocation4 + $0xf0] ss:$8 sps:$4 sm:$0xff]  }
  0x7f   :  { %747 = vmatprep.subr.bf16.mxu0 %v2157_v31  ;;  %1121 = vmatprep.subr.bf16.mxu1 %v2292_v24  ;;  %v2297_v31 = vld [vmem:[#allocation4 + $0xb0] ss:$8 sps:$4 sm:$0xff]   ;;  %v2312_v24 = vld [vmem:[#allocation6 + $0x4] ss:$8 sps:$4 sm:$0xff]  }
  0x82   :  { %748 = vmatpush1.bf16.msra.mxu0 %v2159_v32  ;;  %1122 = vmatpush1.bf16.msra.mxu1 %v2294_v27  ;;  %v2298_v32 = vld [vmem:[#allocation4 + $0xc4] ss:$8 sps:$4 sm:$0xff]  }
  0x83   :  { %749 = vmatprep.subr.bf16.mxu0 %v2160_v33  ;;  %1123 = vmatprep.subr.bf16.mxu1 %v2295_v28  ;;  %v2208_v33 = vld [vmem:[#allocation2 + $0x1f0] ss:$8 sps:$4 sm:$0xff]   ;;  %v213_v28 = vld [vmem:[%s2779_s2] sm:$0x3] }
  0x86   :  { %750 = vmatpush1.bf16.msra.mxu0 %v2162_v34  ;;  %v96_v34 = vld [vmem:[%s2777_s0 + $0x10] sm:$0xff]  ;;  %1124 = vmatpush1.bf16.msra.mxu1 %v2297_v31 }
  0x87   :  { %762 = vmatprep.subr.bf16.mxu0 %v2165_v35  ;;  %v103_v35 = vld [vmem:[%s2777_s0 + $0x48] sm:$0xff]  ;;  %1125 = vmatprep.subr.bf16.mxu1 %v2298_v32 }
  0x89   :  { %752 = vmatmul.mubr.bf16.vlgmr.msra.gmra.mrb[0].mxu0 %v108_v40  ;;  %v110_v40 = vpack.c.bf16 %v103_v35, %v96_v34 }
  0x8a   :  { %763 = vmatpush1.bf16.msra.mxu0 %v2163_v41  ;;  %794 = vmatprep.mubr.bf16.mxu0 %v111_v42  ;;  %v2301_v41 = vld [vmem:[#allocation4 + $0xd4] ss:$8 sps:$4 sm:$0xff]   ;;  %v2211_v42 = vld [vmem:[#allocation2 + $0x200] ss:$8 sps:$4 sm:$0xff]  }
  0x8b   :  { %764 = vmatprep.subr.bf16.mxu0 %v2168_v43  ;;  %v113_v43 = vpack.c.bf16 %v106_v38, %v99_v37  ;;  %1126 = vmatpush1.bf16.msra.mxu1 %v2300_v39 }
  0x8c   :  { %1127 = vmatprep.subr.bf16.mxu1 %v2301_v41 }
  0x8e   :  { %765 = vmatpush1.bf16.msra.mxu0 %v2166_v44  ;;  %v2216_v44 = vld [vmem:[#allocation2 + $0x214] ss:$8 sps:$4 sm:$0xff]  }
  0x8f   :  { %766 = vmatprep.subr.bf16.mxu0 %v2171_v45  ;;  %v2214_v45 = vld [vmem:[#allocation2 + $0x210] ss:$8 sps:$4 sm:$0xff]   ;;  %1128 = vmatpush1.bf16.msra.mxu1 %v2303_v19 }
  0x90   :  { %1129 = vmatprep.subr.bf16.mxu1 %v2304_v20 }
  0x92   :  { %767 = vmatpush1.bf16.msra.mxu0 %v2169_v46  ;;  %v2219_v46 = vld [vmem:[#allocation2 + $0x224] ss:$8 sps:$4 sm:$0xff]  }
  0x93   :  { %768 = vmatprep.subr.bf16.mxu0 %v2174_v47  ;;  %v2217_v47 = vld [vmem:[#allocation2 + $0x220] ss:$8 sps:$4 sm:$0xff]  }
  0x96   :  { %769 = vmatpush1.bf16.msra.mxu0 %v2172_v48  ;;  %v2222_v48 = vld [vmem:[#allocation2 + $0x234] ss:$8 sps:$4 sm:$0xff]  }
  0x97   :  { %770 = vmatprep.subr.bf16.mxu0 %v2177_v49  ;;  %v2220_v49 = vld [vmem:[#allocation2 + $0x230] ss:$8 sps:$4 sm:$0xff]  }
  0x9a   :  { %771 = vmatpush1.bf16.msra.mxu0 %v2175_v53  ;;  %v2226_v53 = vld [vmem:[#allocation2 + $0x250] ss:$8 sps:$4 sm:$0xff]  }
  0x9b   :  { %772 = vmatprep.subr.bf16.mxu0 %v2180_v54  ;;  %v2231_v54 = vld [vmem:[#allocation2 + $0x264] ss:$8 sps:$4 sm:$0xff]  }
  0x9e   :  { %773 = vmatpush1.bf16.msra.mxu0 %v2178_v57  ;;  %v2232_v57 = vld [vmem:[#allocation2 + $0x270] ss:$8 sps:$4 sm:$0xff]  }
  0x9f   :  { %774 = vmatprep.subr.bf16.mxu0 %v2183_v58  ;;  %v2237_v58 = vld [vmem:[#allocation2 + $0x284] ss:$8 sps:$4 sm:$0xff]  }
  0xa2   :  { %775 = vmatpush1.bf16.msra.mxu0 %v2181_v59  ;;  %v2235_v59 = vld [vmem:[#allocation2 + $0x280] ss:$8 sps:$4 sm:$0xff]  }
  0xa3   :  { %776 = vmatprep.subr.bf16.mxu0 %v2186_v62  ;;  %v2243_v62 = vld [vmem:[#allocation2 + $0x2a4] ss:$8 sps:$4 sm:$0xff]  }
  0xa6   :  { %777 = vmatpush1.bf16.msra.mxu0 %v2184_v1  ;;  %v2244_v1 = vld [vmem:[#allocation2 + $0x2b0] ss:$8 sps:$4 sm:$0xff]  }
  0xa7   :  { %778 = vmatprep.subr.bf16.mxu0 %v2189_v2  ;;  %v2249_v2 = vld [vmem:[#allocation2 + $0x2c4] ss:$8 sps:$4 sm:$0xff]  }
  0xaa   :  { %779 = vmatpush1.bf16.msra.mxu0 %v2187_v5  ;;  %v2250_v5 = vld [vmem:[#allocation2 + $0x2d0] ss:$8 sps:$4 sm:$0xff]  }
  0xab   :  { %780 = vmatprep.subr.bf16.mxu0 %v2192_v6  ;;  %v2255_v6 = vld [vmem:[#allocation2 + $0x2e4] ss:$8 sps:$4 sm:$0xff]  }
  0xae   :  { %781 = vmatpush1.bf16.msra.mxu0 %v2190_v9  ;;  %v2256_v9 = vld [vmem:[#allocation2 + $0x2f0] ss:$8 sps:$4 sm:$0xff]  }
  0xaf   :  { %782 = vmatprep.subr.bf16.mxu0 %v2195_v10  ;;  %v98_v10 = vld [vmem:[%s2777_s0 + $0x20] sm:$0xff] }
  0xb2   :  { %783 = vmatpush1.bf16.msra.mxu0 %v2193_v13  ;;  %v112_v13 = vpack.c.bf16 %v105_v11, %v98_v10  ;;  %v2352_v10 = vld [vmem:[#allocation6 + $0xe0] ss:$8 sps:$4 sm:$0xff]   ;;  %v2357_v11 = vld [vmem:[#allocation6 + $0xf4] ss:$8 sps:$4 sm:$0xff]  }
  0xb3   :  { %784 = vmatprep.subr.bf16.mxu0 %v2198_v14  ;;  %v2259_v14 = vld [vmem:[#allocation2 + $0x300] ss:$8 sps:$4 sm:$0xff]  }
  0xb6   :  { %785 = vmatpush1.bf16.msra.mxu0 %v2196_v17  ;;  %v107_v17 = vld [vmem:[%s2777_s0 + $0x68] sm:$0xff] }
  0xb7   :  { %786 = vmatprep.subr.bf16.mxu0 %v2201_v18  ;;  %v114_v18 = vpack.c.bf16 %v107_v17, %v100_v16 }
  0xba   :  { %787 = vmatpush1.bf16.msra.mxu0 %v2199_v21  ;;  %v2306_v21 = vld [vmem:[#allocation4 + $0xe0] ss:$8 sps:$4 sm:$0xff]  }
  0xbb   :  { %788 = vmatprep.subr.bf16.mxu0 %v2204_v22  ;;  %1130 = vmatpush1.bf16.msra.mxu1 %v2306_v21  ;;  %v2307_v22 = vld [vmem:[#allocation4 + $0xf4] ss:$8 sps:$4 sm:$0xff]  }
  0xbc   :  { %1131 = vmatprep.subr.bf16.mxu1 %v2307_v22 }
  0xbe   :  { %789 = vmatpush1.bf16.msra.mxu0 %v2202_v25  ;;  %v215_v25 = vlaneseq }
  0xbf   :  { %790 = vmatprep.subr.bf16.mxu0 %v2207_v26  ;;  %1132 = vmatpush1.bf16.msra.mxu1 %v2309_v23 }
  0xc0   :  { %1354 = vmatprep.subr.bf16.mxu1 %v2312_v24  ;;  %v216_v26 = vshrl.u32 %v215_v25, 7 }
  0xc2   :  { %791 = vmatpush1.bf16.msra.mxu0 %v2205_v29  ;;  %v2699_v27 = vsub.s32 0, %v216_v26  ;;  %v2704_v29 = vsub.s32 1, %v216_v26 }
  0xc3   :  { %792 = vmatprep.subr.bf16.mxu0 %v2210_v30 }
  0xc4   :  { %v218_v30 = vrot.slane %v213_v28, %v2699_v27  ;;  %v222_v31 = vrot.slane %v213_v28, %v2704_v29 }
  0xc6   :  { %793 = vmatpush1.bf16.msra.mxu0 %v2208_v33 }
  0xc7   :  { %805 = vmatprep.subr.bf16.mxu0 %v2213_v36 }
  0xc9   :  { %795 = vmatmul.mubr.bf16.vlgmr.msra.gmra.mrb[0].mxu0 %v110_v40 }
  0xca   :  { %806 = vmatpush1.bf16.msra.mxu0 %v2211_v42  ;;  %837 = vmatprep.mubr.bf16.mxu0 %v113_v43 }
  0xcb   :  { %807 = vmatprep.subr.bf16.mxu0 %v2216_v44 }
  0xce   :  { %808 = vmatpush1.bf16.msra.mxu0 %v2214_v45 }
  0xcf   :  { %809 = vmatprep.subr.bf16.mxu0 %v2219_v46  ;;  %v2310_v46 = vld [vmem:[#allocation6] ss:$8 sps:$4 sm:$0xff]  }
  0xd2   :  { %810 = vmatpush1.bf16.msra.mxu0 %v2217_v47  ;;  %v2315_v47 = vld [vmem:[#allocation6 + $0x14] ss:$8 sps:$4 sm:$0xff]  }
  0xd3   :  { %811 = vmatprep.subr.bf16.mxu0 %v2222_v48  ;;  %v2313_v48 = vld [vmem:[#allocation6 + $0x10] ss:$8 sps:$4 sm:$0xff]  }
  0xd6   :  { %812 = vmatpush1.bf16.msra.mxu0 %v2220_v49  ;;  %v2318_v49 = vld [vmem:[#allocation6 + $0x24] ss:$8 sps:$4 sm:$0xff]  }
  0xd7   :  { %813 = vmatprep.subr.bf16.mxu0 %v2225_v50  ;;  %v2316_v50 = vld [vmem:[#allocation6 + $0x20] ss:$8 sps:$4 sm:$0xff]  }
  0xda   :  { %814 = vmatpush1.bf16.msra.mxu0 %v2223_v51  ;;  %v2321_v51 = vld [vmem:[#allocation6 + $0x34] ss:$8 sps:$4 sm:$0xff]  }
  0xdb   :  { %815 = vmatprep.subr.bf16.mxu0 %v2228_v52  ;;  %v2319_v52 = vld [vmem:[#allocation6 + $0x30] ss:$8 sps:$4 sm:$0xff]  }
  0xde   :  { %816 = vmatpush1.bf16.msra.mxu0 %v2226_v53  ;;  %v2324_v53 = vld [vmem:[#allocation6 + $0x44] ss:$8 sps:$4 sm:$0xff]  }
  0xdf   :  { %817 = vmatprep.subr.bf16.mxu0 %v2231_v54  ;;  %v2322_v54 = vld [vmem:[#allocation6 + $0x40] ss:$8 sps:$4 sm:$0xff]  }
  0xe2   :  { %818 = vmatpush1.bf16.msra.mxu0 %v2229_v55  ;;  %v2327_v55 = vld [vmem:[#allocation6 + $0x54] ss:$8 sps:$4 sm:$0xff]  }
  0xe3   :  { %819 = vmatprep.subr.bf16.mxu0 %v2234_v56  ;;  %v2325_v56 = vld [vmem:[#allocation6 + $0x50] ss:$8 sps:$4 sm:$0xff]  }
  0xe6   :  { %820 = vmatpush1.bf16.msra.mxu0 %v2232_v57  ;;  %v2330_v57 = vld [vmem:[#allocation6 + $0x64] ss:$8 sps:$4 sm:$0xff]  }
  0xe7   :  { %821 = vmatprep.subr.bf16.mxu0 %v2237_v58  ;;  %v2328_v58 = vld [vmem:[#allocation6 + $0x60] ss:$8 sps:$4 sm:$0xff]  }
  0xea   :  { %822 = vmatpush1.bf16.msra.mxu0 %v2235_v59  ;;  %v2333_v59 = vld [vmem:[#allocation6 + $0x74] ss:$8 sps:$4 sm:$0xff]  }
  0xeb   :  { %823 = vmatprep.subr.bf16.mxu0 %v2240_v60  ;;  %v2331_v60 = vld [vmem:[#allocation6 + $0x70] ss:$8 sps:$4 sm:$0xff]  }
  0xee   :  { %824 = vmatpush1.bf16.msra.mxu0 %v2238_v61  ;;  %v2336_v61 = vld [vmem:[#allocation6 + $0x84] ss:$8 sps:$4 sm:$0xff]  }
  0xef   :  { %825 = vmatprep.subr.bf16.mxu0 %v2243_v62  ;;  %v2334_v62 = vld [vmem:[#allocation6 + $0x80] ss:$8 sps:$4 sm:$0xff]  }
  0xf2   :  { %826 = vmatpush1.bf16.msra.mxu0 %v2241_v63  ;;  %v2339_v63 = vld [vmem:[#allocation6 + $0x94] ss:$8 sps:$4 sm:$0xff]  }
  0xf3   :  { %827 = vmatprep.subr.bf16.mxu0 %v2246_v0  ;;  %v2337_v0 = vld [vmem:[#allocation6 + $0x90] ss:$8 sps:$4 sm:$0xff]  }
  0xf6   :  { %828 = vmatpush1.bf16.msra.mxu0 %v2244_v1  ;;  %v2342_v1 = vld [vmem:[#allocation6 + $0xa4] ss:$8 sps:$4 sm:$0xff]  }
  0xf7   :  { %829 = vmatprep.subr.bf16.mxu0 %v2249_v2  ;;  %v2340_v2 = vld [vmem:[#allocation6 + $0xa0] ss:$8 sps:$4 sm:$0xff]  }
  0xfa   :  { %830 = vmatpush1.bf16.msra.mxu0 %v2247_v3  ;;  %v2345_v3 = vld [vmem:[#allocation6 + $0xb4] ss:$8 sps:$4 sm:$0xff]  }
  0xfb   :  { %831 = vmatprep.subr.bf16.mxu0 %v2252_v4  ;;  %v2343_v4 = vld [vmem:[#allocation6 + $0xb0] ss:$8 sps:$4 sm:$0xff]  }
  0xfe   :  { %832 = vmatpush1.bf16.msra.mxu0 %v2250_v5  ;;  %v2348_v5 = vld [vmem:[#allocation6 + $0xc4] ss:$8 sps:$4 sm:$0xff]  }
  0xff   :  { %833 = vmatprep.subr.bf16.mxu0 %v2255_v6  ;;  %v2346_v6 = vld [vmem:[#allocation6 + $0xc0] ss:$8 sps:$4 sm:$0xff]  }
 0x102   :  { %834 = vmatpush1.bf16.msra.mxu0 %v2253_v7  ;;  %v2351_v7 = vld [vmem:[#allocation6 + $0xd4] ss:$8 sps:$4 sm:$0xff]  }
 0x103   :  { %835 = vmatprep.subr.bf16.mxu0 %v2258_v8  ;;  %v2349_v8 = vld [vmem:[#allocation6 + $0xd0] ss:$8 sps:$4 sm:$0xff]  }
 0x106   :  { %836 = vmatpush1.bf16.msra.mxu0 %v2256_v9  ;;  %v2354_v9 = vld [vmem:[#allocation6 + $0xe4] ss:$8 sps:$4 sm:$0xff]  }
 0x107   :  { %848 = vmatprep.subr.bf16.mxu0 %v2261_v12  ;;  %v2355_v12 = vld [vmem:[#allocation6 + $0xf0] ss:$8 sps:$4 sm:$0xff]  }
 0x109   :  { %838 = vmatmul.mubr.bf16.vlgmr.msra.gmra.mrb[0].mxu0 %v112_v13  ;;  %v2360_v13 = vld [vmem:[#allocation7 + $0x4] ss:$8 sps:$4 sm:$0xff]  }
 0x10a   :  { %849 = vmatpush1.bf16.msra.mxu0 %v2259_v14  ;;  %880 = vmatprep.mubr.bf16.mxu0 %v2522_v15  ;;  %v929_v14 = vld [vmem:[%s2781_s4] sm:$0x3] }
 0x10b   :  { %v934_v15 = vrot.slane %v929_v14, %v2699_v27  ;;  %v938_v16 = vrot.slane %v929_v14, %v2704_v29 }
 0x115   :  { %1947 = vmatmul.mubr.msk.bf16.vlgmr.msra.gmra.mrb[0].mxu0 %vm715_vm0, %v114_v18 }
 0x1e8   :  { %v882_v32 = vpop.f32.mrb[0].mxu0 }
 0x1e9   :  { %v2092_v33 = vadd.f32 %v882_v32, %v218_v30  ;;  %v884_v34 = vpop.f32.mrb[1].mxu0 }
 0x1ea   :  { %v2093_v35 = vadd.f32 %v884_v34, %v222_v31  ;;  %v886_v36 = vpop.f32.mrb[2].mxu0  ;;  %v2363_v34 = vld [vmem:[#allocation7 + $0x14] ss:$8 sps:$4 sm:$0xff]  }
 0x1eb   :  { %v2094_v37 = vadd.f32 %v886_v36, %v218_v30  ;;  %v888_v38 = vpop.f32.mrb[3].mxu0  ;;  %v891_v40 = vmax.f32 %v2092_v33, 0.0  ;;  %v2358_v33 = vld [vmem:[#allocation7] ss:$8 sps:$4 sm:$0xff]   ;;  %v2366_v36 = vld [vmem:[#allocation7 + $0x24] ss:$8 sps:$4 sm:$0xff]  }
 0x1ec   :  { %v2095_v39 = vadd.f32 %v888_v38, %v222_v31  ;;  %v892_v42 = vmax.f32 %v2093_v35, 0.0  ;;  %v2361_v35 = vld [vmem:[#allocation7 + $0x10] ss:$8 sps:$4 sm:$0xff]   ;;  %v2369_v38 = vld [vmem:[#allocation7 + $0x34] ss:$8 sps:$4 sm:$0xff]  }
 0x1ed   :  { %v893_v41 = vmax.f32 %v2094_v37, 0.0  ;;  %v2364_v37 = vld [vmem:[#allocation7 + $0x20] ss:$8 sps:$4 sm:$0xff]  }
 0x1ee   :  { %v894_v43 = vmax.f32 %v2095_v39, 0.0  ;;  %v2367_v39 = vld [vmem:[#allocation7 + $0x30] ss:$8 sps:$4 sm:$0xff]  }
 0x1ef   :  { %v895_v44 = vpack.c.bf16 %v893_v41, %v891_v40  ;;  %v2372_v40 = vld [vmem:[#allocation7 + $0x44] ss:$8 sps:$4 sm:$0xff]   ;;  %v2370_v41 = vld [vmem:[#allocation7 + $0x40] ss:$8 sps:$4 sm:$0xff]  }
 0x1f0   :  { %v896_v45 = vpack.c.bf16 %v894_v43, %v892_v42  ;;  %v2375_v42 = vld [vmem:[#allocation7 + $0x54] ss:$8 sps:$4 sm:$0xff]   ;;  %v2373_v43 = vld [vmem:[#allocation7 + $0x50] ss:$8 sps:$4 sm:$0xff]  }
 0x1f2   :  { %1133 = vmatprep.mubr.bf16.mxu1 %v896_v45  ;;  %v2376_v45 = vld [vmem:[#allocation7 + $0x60] ss:$8 sps:$4 sm:$0xff]  }
 0x1f3   :  { %1134 = vmatmul.mubr.bf16.vlgmr.msra.gmra.mrb[0].mxu1 %v895_v44  ;;  %v2378_v44 = vld [vmem:[#allocation7 + $0x64] ss:$8 sps:$4 sm:$0xff]  }
 0x1f4   :  { %1355 = vmatpush1.bf16.msra.mxu1 %v2310_v46  ;;  %v2381_v46 = vld [vmem:[#allocation7 + $0x74] ss:$8 sps:$4 sm:$0xff]  }
 0x1f5   :  { %1356 = vmatprep.subr.bf16.mxu1 %v2315_v47  ;;  %v2379_v47 = vld [vmem:[#allocation7 + $0x70] ss:$8 sps:$4 sm:$0xff]  }
 0x1f8   :  { %1357 = vmatpush1.bf16.msra.mxu1 %v2313_v48  ;;  %v2384_v48 = vld [vmem:[#allocation7 + $0x84] ss:$8 sps:$4 sm:$0xff]  }
 0x1f9   :  { %1358 = vmatprep.subr.bf16.mxu1 %v2318_v49  ;;  %v2382_v49 = vld [vmem:[#allocation7 + $0x80] ss:$8 sps:$4 sm:$0xff]  }
 0x1fc   :  { %1359 = vmatpush1.bf16.msra.mxu1 %v2316_v50  ;;  %v2387_v50 = vld [vmem:[#allocation7 + $0x94] ss:$8 sps:$4 sm:$0xff]  }
 0x1fd   :  { %1360 = vmatprep.subr.bf16.mxu1 %v2321_v51  ;;  %v2385_v51 = vld [vmem:[#allocation7 + $0x90] ss:$8 sps:$4 sm:$0xff]  }
 0x200   :  { %1361 = vmatpush1.bf16.msra.mxu1 %v2319_v52  ;;  %v2390_v52 = vld [vmem:[#allocation7 + $0xa4] ss:$8 sps:$4 sm:$0xff]  }
 0x201   :  { %1362 = vmatprep.subr.bf16.mxu1 %v2324_v53  ;;  %v2388_v53 = vld [vmem:[#allocation7 + $0xa0] ss:$8 sps:$4 sm:$0xff]  }
 0x204   :  { %1363 = vmatpush1.bf16.msra.mxu1 %v2322_v54  ;;  %v2393_v54 = vld [vmem:[#allocation7 + $0xb4] ss:$8 sps:$4 sm:$0xff]  }
 0x205   :  { %1364 = vmatprep.subr.bf16.mxu1 %v2327_v55  ;;  %v2391_v55 = vld [vmem:[#allocation7 + $0xb0] ss:$8 sps:$4 sm:$0xff]  }
 0x208   :  { %1365 = vmatpush1.bf16.msra.mxu1 %v2325_v56  ;;  %v2396_v56 = vld [vmem:[#allocation7 + $0xc4] ss:$8 sps:$4 sm:$0xff]  }
 0x209   :  { %1366 = vmatprep.subr.bf16.mxu1 %v2330_v57  ;;  %v2394_v57 = vld [vmem:[#allocation7 + $0xc0] ss:$8 sps:$4 sm:$0xff]  }
 0x20c   :  { %1367 = vmatpush1.bf16.msra.mxu1 %v2328_v58  ;;  %v2399_v58 = vld [vmem:[#allocation7 + $0xd4] ss:$8 sps:$4 sm:$0xff]  }
 0x20d   :  { %1368 = vmatprep.subr.bf16.mxu1 %v2333_v59  ;;  %v2397_v59 = vld [vmem:[#allocation7 + $0xd0] ss:$8 sps:$4 sm:$0xff]  }
 0x210   :  { %1369 = vmatpush1.bf16.msra.mxu1 %v2331_v60  ;;  %v2402_v60 = vld [vmem:[#allocation7 + $0xe4] ss:$8 sps:$4 sm:$0xff]  }
 0x211   :  { %1370 = vmatprep.subr.bf16.mxu1 %v2336_v61  ;;  %v2400_v61 = vld [vmem:[#allocation7 + $0xe0] ss:$8 sps:$4 sm:$0xff]  }
 0x214   :  { %1371 = vmatpush1.bf16.msra.mxu1 %v2334_v62  ;;  %v2405_v62 = vld [vmem:[#allocation7 + $0xf4] ss:$8 sps:$4 sm:$0xff]  }
 0x215   :  { %1372 = vmatprep.subr.bf16.mxu1 %v2339_v63  ;;  %v2403_v63 = vld [vmem:[#allocation7 + $0xf0] ss:$8 sps:$4 sm:$0xff]  }
 0x218   :  { %1373 = vmatpush1.bf16.msra.mxu1 %v2337_v0  ;;  %v2406_v0 = vld [vmem:[%s2786_s9 + $0x40] sm:$0xff]  }
 0x219   :  { %1374 = vmatprep.subr.bf16.mxu1 %v2342_v1  ;;  %v1182_v1 = vld [vmem:[%s2783_s6] sm:$0x3] }
 0x21c   :  { %1375 = vmatpush1.bf16.msra.mxu1 %v2340_v2  ;;  %v1187_v2 = vrot.slane %v1182_v1, %v2699_v27 }
 0x21d   :  { %1376 = vmatprep.subr.bf16.mxu1 %v2345_v3  ;;  %v1191_v3 = vrot.slane %v1182_v1, %v2704_v29 }
 0x220   :  { %1377 = vmatpush1.bf16.msra.mxu1 %v2343_v4 }
 0x221   :  { %1378 = vmatprep.subr.bf16.mxu1 %v2348_v5 }
 0x224   :  { %1379 = vmatpush1.bf16.msra.mxu1 %v2346_v6 }
 0x225   :  { %1380 = vmatprep.subr.bf16.mxu1 %v2351_v7 }
 0x228   :  { %1381 = vmatpush1.bf16.msra.mxu1 %v2349_v8 }
 0x229   :  { %1382 = vmatprep.subr.bf16.mxu1 %v2354_v9 }
 0x22c   :  { %1383 = vmatpush1.bf16.msra.mxu1 %v2352_v10 }
 0x22d   :  { %1384 = vmatprep.subr.bf16.mxu1 %v2357_v11 }
 0x230   :  { %1385 = vmatpush1.bf16.msra.mxu1 %v2355_v12 }
 0x231   :  { %1607 = vmatprep.subr.bf16.mxu1 %v2360_v13 }
 0x2c6   :  { %v1135_v17 = vpop.f32.mrb[0].mxu1 }
 0x2c7   :  { %v1136_v18 = vadd.f32 %v1135_v17, %v934_v15  ;;  %v1137_v19 = vpop.f32.mrb[1].mxu1 }
 0x2c8   :  { %v1138_v20 = vadd.f32 %v1137_v19, %v938_v16  ;;  %v1139_v21 = vpop.f32.mrb[2].mxu1  ;;  %v2408_v19 = vld [vmem:[%s2786_s9 + $0x48] sm:$0xff]  }
 0x2c9   :  { %v1140_v22 = vadd.f32 %v1139_v21, %v934_v15  ;;  %v1141_v23 = vpop.f32.mrb[3].mxu1  ;;  %v1144_v25 = vmax.f32 %v1136_v18, 0.0  ;;  %v2407_v18 = vld [vmem:[%s2786_s9] sm:$0xff]   ;;  %v2410_v21 = vld [vmem:[%s2786_s9 + $0x50] sm:$0xff]  }
 0x2ca   :  { %v1142_v24 = vadd.f32 %v1141_v23, %v938_v16  ;;  %v1145_v28 = vmax.f32 %v1138_v20, 0.0  ;;  %v2409_v20 = vld [vmem:[%s2786_s9 + $0x8] sm:$0xff]   ;;  %v2412_v23 = vld [vmem:[%s2786_s9 + $0x58] sm:$0xff]  }
 0x2cb   :  { %v1146_v26 = vmax.f32 %v1140_v22, 0.0  ;;  %v2411_v22 = vld [vmem:[%s2786_s9 + $0x10] sm:$0xff]  }
 0x2cc   :  { %v1147_v30 = vmax.f32 %v1142_v24, 0.0  ;;  %v2413_v24 = vld [vmem:[%s2786_s9 + $0x18] sm:$0xff]  }
 0x2cd   :  { %v1148_v31 = vpack.c.bf16 %v1146_v26, %v1144_v25  ;;  %v2414_v25 = vld [vmem:[%s2786_s9 + $0x60] sm:$0xff]  }
 0x2ce   :  { %v1149_v32 = vpack.c.bf16 %v1147_v30, %v1145_v28  ;;  %v2415_v26 = vld [vmem:[%s2786_s9 + $0x20] sm:$0xff]   ;;  %v2416_v28 = vld [vmem:[%s2786_s9 + $0x68] sm:$0xff]  }
 0x2cf   :  { %v2417_v30 = vld [vmem:[%s2786_s9 + $0x28] sm:$0xff]  }
 0x2d0   :  { %1386 = vmatprep.mubr.bf16.mxu1 %v1149_v32  ;;  %v2419_v32 = vld [vmem:[%s2786_s9 + $0x30] sm:$0xff]  }
 0x2d1   :  { %1387 = vmatmul.mubr.bf16.vlgmr.msra.gmra.mrb[4].mxu1 %v1148_v31  ;;  %v2418_v31 = vld [vmem:[%s2786_s9 + $0x70] sm:$0xff]  }
 0x2d2   :  { %1608 = vmatpush1.bf16.msra.mxu1 %v2358_v33  ;;  %v2420_v33 = vld [vmem:[%s2786_s9 + $0x78] sm:$0xff]  }
 0x2d3   :  { %1609 = vmatprep.subr.bf16.mxu1 %v2363_v34  ;;  %v2421_v34 = vld [vmem:[%s2786_s9 + $0x38] sm:$0xff]  }
 0x2d6   :  { %1610 = vmatpush1.bf16.msra.mxu1 %v2361_v35  ;;  %v1435_v35 = vld [vmem:[%s2785_s8] sm:$0x3] }
 0x2d7   :  { %1611 = vmatprep.subr.bf16.mxu1 %v2366_v36  ;;  %v1440_v36 = vrot.slane %v1435_v35, %v2699_v27 }
 0x2da   :  { %1612 = vmatpush1.bf16.msra.mxu1 %v2364_v37  ;;  %v1444_v37 = vrot.slane %v1435_v35, %v2704_v29 }
 0x2db   :  { %1613 = vmatprep.subr.bf16.mxu1 %v2369_v38 }
 0x2de   :  { %1614 = vmatpush1.bf16.msra.mxu1 %v2367_v39 }
 0x2df   :  { %1615 = vmatprep.subr.bf16.mxu1 %v2372_v40 }
 0x2e2   :  { %1616 = vmatpush1.bf16.msra.mxu1 %v2370_v41 }
 0x2e3   :  { %1617 = vmatprep.subr.bf16.mxu1 %v2375_v42 }
 0x2e6   :  { %1618 = vmatpush1.bf16.msra.mxu1 %v2373_v43 }
 0x2e7   :  { %1619 = vmatprep.subr.bf16.mxu1 %v2378_v44 }
 0x2ea   :  { %1620 = vmatpush1.bf16.msra.mxu1 %v2376_v45 }
 0x2eb   :  { %1621 = vmatprep.subr.bf16.mxu1 %v2381_v46 }
 0x2ee   :  { %1622 = vmatpush1.bf16.msra.mxu1 %v2379_v47 }
 0x2ef   :  { %1623 = vmatprep.subr.bf16.mxu1 %v2384_v48 }
 0x2f2   :  { %1624 = vmatpush1.bf16.msra.mxu1 %v2382_v49 }
 0x2f3   :  { %1625 = vmatprep.subr.bf16.mxu1 %v2387_v50 }
 0x2f6   :  { %1626 = vmatpush1.bf16.msra.mxu1 %v2385_v51 }
 0x2f7   :  { %1627 = vmatprep.subr.bf16.mxu1 %v2390_v52 }
 0x2fa   :  { %1628 = vmatpush1.bf16.msra.mxu1 %v2388_v53 }
 0x2fb   :  { %1629 = vmatprep.subr.bf16.mxu1 %v2393_v54  ;;  %v2044_v54 = vld [vmem:[%s2787_s10] ss:$0 sm:$0xff] }
 0x2fe   :  { %1630 = vmatpush1.bf16.msra.mxu1 %v2391_v55 }
 0x2ff   :  { %1631 = vmatprep.subr.bf16.mxu1 %v2396_v56 }
 0x302   :  { %1632 = vmatpush1.bf16.msra.mxu1 %v2394_v57 }
 0x303   :  { %1633 = vmatprep.subr.bf16.mxu1 %v2399_v58 }
 0x306   :  { %1634 = vmatpush1.bf16.msra.mxu1 %v2397_v59 }
 0x307   :  { %1635 = vmatprep.subr.bf16.mxu1 %v2402_v60 }
 0x30a   :  { %1636 = vmatpush1.bf16.msra.mxu1 %v2400_v61 }
 0x30b   :  { %1637 = vmatprep.subr.bf16.mxu1 %v2405_v62 }
 0x30e   :  { %1638 = vmatpush1.bf16.msra.mxu1 %v2403_v63 }
 0x30f   :  { %2070 = vmatprep.subr.bf16.mxu1 %v2406_v0 }
 0x3a4   :  { %v1388_v4 = vpop.f32.mrb[4].mxu1 }
 0x3a5   :  { %v1389_v5 = vadd.f32 %v1388_v4, %v1187_v2  ;;  %v1390_v6 = vpop.f32.mrb[5].mxu1 }
 0x3a6   :  { %v1391_v7 = vadd.f32 %v1390_v6, %v1191_v3  ;;  %v1392_v8 = vpop.f32.mrb[6].mxu1 }
 0x3a7   :  { %v1393_v9 = vadd.f32 %v1392_v8, %v1187_v2  ;;  %v1394_v10 = vpop.f32.mrb[7].mxu1  ;;  %v1397_v12 = vmax.f32 %v1389_v5, 0.0 }
 0x3a8   :  { %v1395_v11 = vadd.f32 %v1394_v10, %v1191_v3  ;;  %v1398_v14 = vmax.f32 %v1391_v7, 0.0 }
 0x3a9   :  { %v1399_v13 = vmax.f32 %v1393_v9, 0.0 }
 0x3aa   :  { %v1400_v15 = vmax.f32 %v1395_v11, 0.0 }
 0x3ab   :  { %v1401_v16 = vpack.c.bf16 %v1399_v13, %v1397_v12 }
 0x3ac   :  { %v1402_v17 = vpack.c.bf16 %v1400_v15, %v1398_v14 }
 0x3ae   :  { %1639 = vmatprep.mubr.bf16.mxu1 %v1402_v17 }
 0x3af   :  { %1640 = vmatmul.mubr.bf16.vlgmr.msra.gmra.mrb[8].mxu1 %v1401_v16 }
 0x3b0   :  { %2071 = vmatpush3.bf16.msra.mxu1 %v2407_v18 }
 0x3b1   :  { %2072 = vmatprep.subr.bf16.mxu1 %v2408_v19 }
 0x3b4   :  { %2073 = vmatpush3.bf16.msra.mxu1 %v2409_v20 }
 0x3b5   :  { %2074 = vmatprep.subr.bf16.mxu1 %v2410_v21 }
 0x3b8   :  { %2075 = vmatpush3.bf16.msra.mxu1 %v2411_v22 }
 0x3b9   :  { %2076 = vmatprep.subr.bf16.mxu1 %v2412_v23 }
 0x3bc   :  { %2077 = vmatpush3.bf16.msra.mxu1 %v2413_v24 }
 0x3bd   :  { %2078 = vmatprep.subr.bf16.mxu1 %v2414_v25 }
 0x3c0   :  { %2079 = vmatpush3.bf16.msra.mxu1 %v2415_v26 }
 0x3c1   :  { %2080 = vmatprep.subr.bf16.mxu1 %v2416_v28 }
 0x3c4   :  { %2081 = vmatpush3.bf16.msra.mxu1 %v2417_v30 }
 0x3c5   :  { %2082 = vmatprep.subr.bf16.mxu1 %v2418_v31 }
 0x3c8   :  { %2083 = vmatpush3.bf16.msra.mxu1 %v2419_v32 }
 0x3c9   :  { %2084 = vmatprep.subr.bf16.mxu1 %v2420_v33 }
 0x3cc   :  { %2085 = vmatpush3.bf16.msra.mxu1 %v2421_v34 }
 0x482   :  { %v1641_v38 = vpop.f32.mrb[8].mxu1 }
 0x483   :  { %v1642_v39 = vadd.f32 %v1641_v38, %v1440_v36  ;;  %v1643_v40 = vpop.f32.mrb[9].mxu1 }
 0x484   :  { %v1644_v41 = vadd.f32 %v1643_v40, %v1444_v37  ;;  %v1645_v42 = vpop.f32.mrb[10].mxu1 }
 0x485   :  { %v1646_v43 = vadd.f32 %v1645_v42, %v1440_v36  ;;  %v1647_v44 = vpop.f32.mrb[11].mxu1  ;;  %v1650_v46 = vmax.f32 %v1642_v39, 0.0 }
 0x486   :  { %v1648_v45 = vadd.f32 %v1647_v44, %v1444_v37  ;;  %v1651_v48 = vmax.f32 %v1644_v41, 0.0 }
 0x487   :  { %v1652_v47 = vmax.f32 %v1646_v43, 0.0 }
 0x488   :  { %v1653_v49 = vmax.f32 %v1648_v45, 0.0 }
 0x489   :  { %v1654_v50 = vpack.c.bf16 %v1652_v47, %v1650_v46 }
 0x48a   :  { %v1655_v51 = vpack.c.bf16 %v1653_v49, %v1651_v48 }
 0x48c   :  { %1823 = vmatprep.mubr.bf16.mxu1 %v1655_v51 }
 0x48d   :  { %1824 = vmatmul.mubr.bf16.vlgmr.msra.gmra.mrb[12].mxu1 %v1654_v50 }
 0x560   :  { %v2086_v52 = vpop.f32.mrb[12].mxu1 }
 0x561   :  { %v2087_v27 = vpop.f32.mrb[13].mxu1 }
 0x562   :  { %v2088_v53 = vadd.f32 %v2087_v27, %v2086_v52  ;;  %v2089_v29 = vpop.f32.mrb[14].mxu1 }
 0x563   :  { %v2090_v55 = vpop.f32.mrb[15].mxu1 }
 0x564   :  { %v2091_v56 = vadd.f32 %v2090_v55, %v2089_v29  ;;  %v1826_v57 = vadd.f32 %v2088_v53, %v2044_v54 }
 0x566   :  { %v1829_v58 = vadd.f32 %v2091_v56, %v2044_v54 }
 0x568   :  { %v2068_v59 = vpack.c.bf16 %v1829_v58, %v1826_v57 }
 0x56a   :  { %2069 = vst [vmem:[%s2788_s11] sm:$0xff] %v2068_v59  }
 0x56b   :  { %1846 = vsyncpa [#allocation3], 1 }
 0x56c   :  { %1847 = vsyncpa [#allocation5], 1 }
 0x56d   :  { %1848 = vsyncpa [#allocation8], 1 }

</bundles_post_ra>
